<compile_context>
chip_gen: v7x
topology: tpu7x:2x2x1
jax: 0.10.0
libtpu: 0.0.40
codegen_flags: <defaults>
</compile_context>

<pallas_src>
import jax
import jax.numpy as jnp
from jax.experimental import pallas as pl
from jax.experimental.pallas import tpu as pltpu

# 2 MiB row tiles -> (2 in bufs + 2 out bufs) * 2 MiB = 8 MiB live VMEM,
# comfortably under every generation's scoped-VMEM default (incl. v5e 16 MiB
# and v7x 64 MiB physical).  Could be raised on v5e/v6e via
# pltpu.get_tpu_info(), but the copy is HBM-bound so the gain is marginal.
_MAX_TILE_BYTES = 2 * 1024 * 1024


def _identity_kernel(x_ref, o_ref):
    # Straight copy of the current tile.
    o_ref[...] = x_ref[...]


def identity_forward(x):
    """Identity.forward(x) = x.

    Per the review: identity needs zero HBM traffic, so the primary path does
    no work at all (no pallas_call, no copy).
    """
    return x


def identity_copy_pallas(x):
    """Fallback Pallas copy kernel (pad-free, slice-free materializing copy)."""
    if x.size == 0:
        return x

    orig_shape = x.shape

    # Collapse leading dims only; keep the last dim at full extent so the
    # trailing block dim equals the array dim (no (8,128) padding needed).
    if x.ndim == 0:
        x2d = x.reshape(1, 1)
    elif x.ndim == 1:
        x2d = x.reshape(1, x.shape[0])
    else:
        x2d = x.reshape(-1, x.shape[-1])
    rows, cols = x2d.shape
    itemsize = jnp.dtype(x.dtype).itemsize

    # Row tile: full extent for small inputs, otherwise the largest multiple
    # of 8 rows that keeps a tile under _MAX_TILE_BYTES.
    max_rows = max(8, (_MAX_TILE_BYTES // max(1, cols * itemsize)) // 8 * 8)
    tile_rows = rows if rows <= max_rows else max_rows
    grid = (pl.cdiv(rows, tile_rows),)

    out2d = pl.pallas_call(
        _identity_kernel,
        out_shape=jax.ShapeDtypeStruct((rows, cols), x.dtype),
        grid_spec=pl.GridSpec(
            grid=grid,
            in_specs=[pl.BlockSpec((tile_rows, cols), lambda i: (i, 0))],
            out_specs=pl.BlockSpec((tile_rows, cols), lambda i: (i, 0)),
        ),
        compiler_params=pltpu.CompilerParams(
            dimension_semantics=("arbitrary",),
        ),
        cost_estimate=pl.CostEstimate(
            flops=0,
            transcendentals=0,
            bytes_accessed=2 * rows * cols * itemsize,
        ),
    )(x2d)

    return out2d.reshape(orig_shape)


if __name__ == "__main__":
    key = jax.random.PRNGKey(0)
    # Small NCHW input, consistent with a CNN-style module.
    x = jax.random.normal(key, (2, 4, 16, 16), dtype=jnp.float32)

    # Primary (optimized) path: true identity, no HBM traffic.
    y = identity_forward(x)

    # Exercise the Pallas fallback copy kernel once.
    y_k = identity_copy_pallas(x)

    jax.block_until_ready((y, y_k))

    assert y.shape == x.shape and y.dtype == x.dtype
    assert y_k.shape == x.shape and y_k.dtype == x.dtype
    assert bool(jnp.all(y == x))
    assert bool(jnp.all(y_k == x))
    print("KERNEL_OK")
</pallas_src>

<mosaic_0001>
module attributes {stable_mosaic.version = 11 : i64} {
  func.func @_identity_kernel(%arg0: i32, %arg1: memref<128x16xf32, #tpu.memory_space<vmem>>, %arg2: memref<128x16xf32, #tpu.memory_space<vmem>>) attributes {dimension_semantics = [#tpu.dimension_semantics<arbitrary>], iteration_bounds = array<i64: 1>, scalar_prefetch = 0 : i64, scratch_operands = 0 : i64, tpu.core_type = #tpu.core_type<tc>, window_params = [{transform_indices = @transform_0, window_bounds = array<i64: 128, 16>}, {transform_indices = @transform_1, window_bounds = array<i64: 128, 16>}]} {
    %c0 = arith.constant 0 : index
    %c0_0 = arith.constant 0 : index
    %0 = vector.load %arg1[%c0, %c0_0] : memref<128x16xf32, #tpu.memory_space<vmem>>, vector<128x16xf32>
    %c0_1 = arith.constant 0 : index
    %c0_2 = arith.constant 0 : index
    %1 = vector.load %arg2[%c0_1, %c0_2] : memref<128x16xf32, #tpu.memory_space<vmem>>, vector<128x16xf32>
    tpu.vector_store %arg2[%c0_1, %c0_2], %0 {strides = array<i32>} : memref<128x16xf32, #tpu.memory_space<vmem>>, vector<128x16xf32>,
    return
  }
  func.func @transform_0(%arg0: i32) -> (i32, i32) {
    %c0_i32 = arith.constant 0 : i32
    %c0_i32_0 = arith.constant 0 : i32
    return %arg0, %c0_i32 : i32, i32
  }
  func.func @transform_1(%arg0: i32) -> (i32, i32) {
    %c0_i32 = arith.constant 0 : i32
    %c0_i32_0 = arith.constant 0 : i32
    return %arg0, %c0_i32 : i32, i32
  }
}

</mosaic_0001>

<bundles_post_ra>
// kernel: tpu_custom_call.1
= control target key start
LH: loop header
LB: loop body
LE: loop exit
PB: predicated region body
PF: predicated region fallthrough
CT: control target
= control target key end

     0   :  { %vm24_vm0 = vcmask 130048   ;;  %s167_s0 = inlined_call_operand.vmem [shape: f32[128,16], index: 0, kind: input, shape index: {}]   ;;  %s168_s1 = inlined_call_operand.vmem [shape: f32[128,16], index: 1, kind: output, shape index: {}]  }
   0x1   :  { %v8_v0 = vld [vmem:[%s167_s0] sm:$0xff]  ;;  %v9_v1 = vld [vmem:[%s167_s0 + $0x8] sm:$0xff]  ;;  %v10_v2 = vld [vmem:[%s167_s0 + $0x10] sm:$0xff] }
   0x2   :  { %25 = vst.msk [vmem:[%s168_s1] sm:$0xff] %vm24_vm0, %v8_v0  ;;  %26 = vst.msk [vmem:[%s168_s1 + $0x8] sm:$0xff] %vm24_vm0, %v9_v1  ;;  %v11_v3 = vld [vmem:[%s167_s0 + $0x18] sm:$0xff]  ;;  %v12_v4 = vld [vmem:[%s167_s0 + $0x20] sm:$0xff] }
   0x3   :  { %27 = vst.msk [vmem:[%s168_s1 + $0x10] sm:$0xff] %vm24_vm0, %v10_v2  ;;  %v13_v5 = vld [vmem:[%s167_s0 + $0x28] sm:$0xff]  ;;  %28 = vst.msk [vmem:[%s168_s1 + $0x18] sm:$0xff] %vm24_vm0, %v11_v3  ;;  %v14_v6 = vld [vmem:[%s167_s0 + $0x30] sm:$0xff] }
   0x4   :  { %29 = vst.msk [vmem:[%s168_s1 + $0x20] sm:$0xff] %vm24_vm0, %v12_v4  ;;  %30 = vst.msk [vmem:[%s168_s1 + $0x28] sm:$0xff] %vm24_vm0, %v13_v5  ;;  %v15_v7 = vld [vmem:[%s167_s0 + $0x38] sm:$0xff]  ;;  %v16_v8 = vld [vmem:[%s167_s0 + $0x40] sm:$0xff] }
   0x5   :  { %31 = vst.msk [vmem:[%s168_s1 + $0x30] sm:$0xff] %vm24_vm0, %v14_v6  ;;  %32 = vst.msk [vmem:[%s168_s1 + $0x38] sm:$0xff] %vm24_vm0, %v15_v7  ;;  %v17_v9 = vld [vmem:[%s167_s0 + $0x48] sm:$0xff]  ;;  %v18_v10 = vld [vmem:[%s167_s0 + $0x50] sm:$0xff] }
   0x6   :  { %33 = vst.msk [vmem:[%s168_s1 + $0x40] sm:$0xff] %vm24_vm0, %v16_v8  ;;  %v19_v11 = vld [vmem:[%s167_s0 + $0x58] sm:$0xff]  ;;  %34 = vst.msk [vmem:[%s168_s1 + $0x48] sm:$0xff] %vm24_vm0, %v17_v9  ;;  %v20_v12 = vld [vmem:[%s167_s0 + $0x60] sm:$0xff] }
   0x7   :  { %35 = vst.msk [vmem:[%s168_s1 + $0x50] sm:$0xff] %vm24_vm0, %v18_v10  ;;  %36 = vst.msk [vmem:[%s168_s1 + $0x58] sm:$0xff] %vm24_vm0, %v19_v11  ;;  %v21_v13 = vld [vmem:[%s167_s0 + $0x68] sm:$0xff]  ;;  %v22_v14 = vld [vmem:[%s167_s0 + $0x70] sm:$0xff] }
   0x8   :  { %37 = vst.msk [vmem:[%s168_s1 + $0x60] sm:$0xff] %vm24_vm0, %v20_v12  ;;  %38 = vst.msk [vmem:[%s168_s1 + $0x68] sm:$0xff] %vm24_vm0, %v21_v13  ;;  %v23_v15 = vld [vmem:[%s167_s0 + $0x78] sm:$0xff] }
   0x9   :  { %39 = vst.msk [vmem:[%s168_s1 + $0x70] sm:$0xff] %vm24_vm0, %v22_v14  ;;  %40 = vst.msk [vmem:[%s168_s1 + $0x78] sm:$0xff] %vm24_vm0, %v23_v15 }

</bundles_post_ra>
